<compile_context>
chip_gen: v6e
topology: v6e:2x2x1
jax: 0.10.0
libtpu: 0.0.40
codegen_flags: <defaults>
</compile_context>

<pallas_src>
import functools

import jax
import jax.numpy as jnp
from jax import lax
from jax.experimental import pallas as pl
from jax.experimental.pallas import tpu as pltpu


def _round_up(v, m):
    return ((v + m - 1) // m) * m


def _vmem_cap_bytes():
    """Usable VMEM budget: physical capacity minus ~25% headroom for compiler
    scratch / semaphores / double buffers.  Conservative 64 MiB fallback."""
    phys = 64 << 20
    try:
        info = pltpu.get_tpu_info()
        phys = int(getattr(info, "vmem_capacity_bytes", phys) or phys)
    except Exception:
        pass
    return (phys // 4) * 3


# ---------------------------------------------------------------------------
# Kernel 1: support = x @ W   (computed once; NOT per adjacency row tile)
# ---------------------------------------------------------------------------
def _support_kernel(x_ref, w_ref, o_ref):
    # x_ref: (tms, Fin) bf16, w_ref: (Fin, fout_p) bf16 (resident),
    # o_ref: (tms, fout_p) bf16.  f32 accumulation on the MXU.
    o_ref[...] = jnp.dot(
        x_ref[...], w_ref[...], preferred_element_type=jnp.float32
    ).astype(o_ref.dtype)


def _compute_support(xb, wb, *, fout_p, vmem_cap):
    B, rows, fin = xb.shape
    tms = rows if rows <= 512 else 512
    est = 2 * (tms * fin + fin * fout_p + tms * fout_p) * 2  # bf16, double-buffered
    vmem_limit = int(min(vmem_cap, max(32 << 20, 2 * est)))
    return pl.pallas_call(
        _support_kernel,
        out_shape=jax.ShapeDtypeStruct((B, rows, fout_p), jnp.bfloat16),
        grid_spec=pltpu.PrefetchScalarGridSpec(
            num_scalar_prefetch=0,
            grid=(B, pl.cdiv(rows, tms)),
            in_specs=[
                pl.BlockSpec((None, tms, fin), lambda b, i: (b, i, 0)),
                pl.BlockSpec((fin, fout_p), lambda b, i: (0, 0)),
            ],
            out_specs=pl.BlockSpec((None, tms, fout_p), lambda b, i: (b, i, 0)),
        ),
        compiler_params=pltpu.CompilerParams(
            dimension_semantics=("parallel", "parallel"),
            vmem_limit_bytes=vmem_limit,
        ),
    )(xb, wb)


# ---------------------------------------------------------------------------
# Kernel 2: out[b, i_tile] (+)= adj[b, i_tile, k_tile] @ support[b, k_tile]
# ---------------------------------------------------------------------------
def _adj_matmul_kernel(adj_ref, sup_ref, o_ref, *, tk, k_rem, resident, single_k):
    # adj_ref: (tm, tk)   caller dtype, cast to bf16 here (no wrapper pre-pass)
    # sup_ref: (n_cols, fout_p) bf16 if resident (DMA'd once per batch),
    #          else (tk, fout_p) bf16 streamed per k step
    # o_ref:   (tm, fout_p) f32  -- accumulated in place across the k axis
    k = pl.program_id(2)

    a = adj_ref[...]
    if k_rem:
        # Partial K-tail boundary block: Pallas padding contents are undefined,
        # so zero them out before they can pollute real output rows.
        limit = jnp.where(k == pl.num_programs(2) - 1, k_rem, tk)
        col = lax.broadcasted_iota(jnp.int32, a.shape, 1)
        a = jnp.where(col < limit, a, jnp.zeros_like(a))
    a = a.astype(jnp.bfloat16)

    if resident and not single_k:
        start = pl.multiple_of(k * tk, 128)
        s = sup_ref[pl.ds(start, tk), :]
    else:
        s = sup_ref[...]

    contrib = jnp.dot(a, s, preferred_element_type=jnp.float32)

    if single_k:
        o_ref[...] = contrib
    else:
        @pl.when(k == 0)
        def _init():
            o_ref[...] = contrib

        @pl.when(k > 0)
        def _accum():
            o_ref[...] += contrib


def graph_convolution(x, adj, weight, *, tm=256, tk=None):
    """x: (B, N, Fin), adj: (B, N, N), weight: (Fin, Fout) -> (B, N, Fout)."""
    B, N, Fin = x.shape
    assert weight.shape[0] == Fin and adj.shape == (B, N, N)
    Fout = weight.shape[1]
    fout_p = _round_up(Fout, 128)          # lane-dense support / output width
    adj_itemsize = adj.dtype.itemsize

    vmem_cap = _vmem_cap_bytes()
    tile_budget = int(vmem_cap * 0.6)      # budget for pipelined tiles
    slab_budget = vmem_cap // 3            # budget for the resident support slab

    # ---- row tile (adj rows / output rows): multiple of 8 or full dim -----
    if tm >= N:
        tm = N
    else:
        tm = max(8, (tm // 8) * 8)
    # Keep at least 2 parallel tiles so both v7x TensorCores get work.
    while B * pl.cdiv(N, tm) < 2 and tm > 8:
        tm = max(8, _round_up(tm // 2, 8))
    n_i = pl.cdiv(N, tm)
    n_rows = n_i * tm                      # padded output row extent

    # ---- K tile (adj columns == support rows) ------------------------------
    if tk is None:
        # Prefer full-K: one contiguous adj DMA per row tile, no k accumulation.
        full_k_est = (2 * tm * N * adj_itemsize     # adj tile, double-buffered
                      + 2 * N * fout_p * 2          # resident bf16 support slab
                      + 2 * tm * fout_p * 4)        # f32 output tile
        if full_k_est <= tile_budget:
            tk = N
        else:
            for cand in (2048, 1024, 512, 256, 128):
                if cand > N:
                    continue
                n_cols_c = _round_up(N, cand)
                res_c = 2 * n_cols_c * fout_p * 2 <= slab_budget
                sup_b = 2 * (n_cols_c if res_c else cand) * fout_p * 2
                est = 2 * tm * cand * adj_itemsize + sup_b + 2 * tm * fout_p * 4
                if est <= tile_budget:
                    tk = cand
                    break
            else:
                tk = 128
    else:
        tk = int(tk)
        if tk >= N:
            tk = N
    if tk != N and tk % 128 != 0:
        raise ValueError("tk must equal N or be a multiple of 128")

    if tk == N:
        n_cols, n_k, k_rem = N, 1, 0
    else:
        n_cols = _round_up(N, tk)
        n_k = n_cols // tk
        k_rem = N % tk

    resident = (n_k == 1) or (2 * n_cols * fout_p * 2 <= slab_budget)
    single_k = n_k == 1

    # ---- support = x @ W (precomputed once; zero rows pad the K tail) ------
    xb = x.astype(jnp.bfloat16)
    if n_cols > N:
        xb = jnp.pad(xb, ((0, 0), (0, n_cols - N), (0, 0)))
    wb = jnp.pad(weight, ((0, 0), (0, fout_p - Fout))).astype(jnp.bfloat16)
    support = _compute_support(xb, wb, fout_p=fout_p, vmem_cap=vmem_cap)

    # ---- adj @ support ------------------------------------------------------
    if resident:
        sup_spec = pl.BlockSpec((None, n_cols, fout_p), lambda b, i, k: (b, 0, 0))
    else:
        sup_spec = pl.BlockSpec((None, tk, fout_p), lambda b, i, k: (b, k, 0))

    sup_vmem = 2 * (n_cols if resident else tk) * fout_p * 2
    est_main = 2 * tm * tk * adj_itemsize + sup_vmem + 2 * tm * fout_p * 4
    vmem_main = int(min(vmem_cap, max(32 << 20, 2 * est_main)))

    cost = pl.CostEstimate(
        flops=2 * B * N * N * fout_p,
        transcendentals=0,
        bytes_accessed=(adj.size * adj_itemsize + support.size * 2
                        + B * n_rows * fout_p * 4),
    )

    kernel = functools.partial(
        _adj_matmul_kernel, tk=tk, k_rem=k_rem, resident=resident, single_k=single_k
    )

    out_padded = pl.pallas_call(
        kernel,
        out_shape=jax.ShapeDtypeStruct((B, n_rows, fout_p), jnp.float32),
        grid_spec=pltpu.PrefetchScalarGridSpec(
            num_scalar_prefetch=0,
            grid=(B, n_i, n_k),
            in_specs=[
                pl.BlockSpec((None, tm, tk), lambda b, i, k: (b, i, k)),
                sup_spec,
            ],
            out_specs=pl.BlockSpec((None, tm, fout_p), lambda b, i, k: (b, i, 0)),
        ),
        compiler_params=pltpu.CompilerParams(
            dimension_semantics=("parallel", "parallel", "arbitrary"),
            vmem_limit_bytes=vmem_main,
        ),
        cost_estimate=cost,
    )(adj, support)

    return out_padded[:, :N, :Fout].astype(x.dtype)


def xavier_uniform(key, fan_in, fan_out, dtype=jnp.float32):
    # Matches torch.nn.init.xavier_uniform_: U(-a, a), a = sqrt(6/(fan_in+fan_out))
    bound = (6.0 / (fan_in + fan_out)) ** 0.5
    return jax.random.uniform(key, (fan_in, fan_out), dtype=dtype,
                              minval=-bound, maxval=bound)


def _reference(x, adj, weight, *, bf16_faithful):
    hp = lax.Precision.HIGHEST
    if bf16_faithful:
        xr = x.astype(jnp.bfloat16).astype(jnp.float32)
        wr = weight.astype(jnp.bfloat16).astype(jnp.float32)
        ar = adj.astype(jnp.bfloat16).astype(jnp.float32)
        sup = jnp.einsum("bnf,fo->bno", xr, wr, precision=hp)
        sup = sup.astype(jnp.bfloat16).astype(jnp.float32)
    else:
        ar = adj
        sup = jnp.einsum("bnf,fo->bno", x, weight, precision=hp)
    return jnp.einsum("bij,bjd->bid", ar, sup, precision=hp)


if __name__ == "__main__":
    key = jax.random.PRNGKey(0)

    # --- small shapes implied by the module forward -------------------------
    B, N, Fin, Fout = 2, 8, 16, 32
    kx, kadj, kw = jax.random.split(key, 3)
    x = jax.random.normal(kx, (B, N, Fin), dtype=jnp.float32)
    adj = jax.random.normal(kadj, (B, N, N), dtype=jnp.float32)
    weight = xavier_uniform(kw, Fin, Fout)

    out = jax.block_until_ready(graph_convolution(x, adj, weight))
    assert out.shape == (B, N, Fout) and out.dtype == x.dtype

    ref_bf = _reference(x, adj, weight, bf16_faithful=True)
    assert jnp.allclose(out, ref_bf, atol=2e-2, rtol=2e-2), "bf16-faithful mismatch"
    ref_f32 = _reference(x, adj, weight, bf16_faithful=False)
    assert jnp.allclose(out, ref_f32, atol=8e-2, rtol=8e-2), "f32 reference mismatch"

    # --- second shape forcing the tiled-K / masked-tail / multi-row-tile path
    B2, N2 = 2, 200
    kx2, kadj2 = jax.random.split(kadj, 2)
    x2 = jax.random.normal(kx2, (B2, N2, Fin), dtype=jnp.float32)
    adj2 = jax.random.normal(kadj2, (B2, N2, N2), dtype=jnp.float32)
    out2 = jax.block_until_ready(graph_convolution(x2, adj2, weight, tm=64, tk=128))
    assert out2.shape == (B2, N2, Fout)
    ref2 = _reference(x2, adj2, weight, bf16_faithful=True)
    assert jnp.allclose(out2, ref2, atol=1e-1, rtol=2e-2), "tiled-path mismatch"

    print("KERNEL_OK")
</pallas_src>

<mosaic_0001>
module attributes {stable_mosaic.version = 11 : i64} {
  func.func @_support_kernel(%arg0: i32, %arg1: i32, %arg2: memref<1x8x16xbf16, #tpu.memory_space<vmem>>, %arg3: memref<16x128xbf16, #tpu.memory_space<vmem>>, %arg4: memref<1x8x128xbf16, #tpu.memory_space<vmem>>) attributes {dimension_semantics = [#tpu.dimension_semantics<parallel>, #tpu.dimension_semantics<parallel>], iteration_bounds = array<i64: 2, 1>, scalar_prefetch = 0 : i64, scratch_operands = 0 : i64, tpu.core_type = #tpu.core_type<tc>, window_params = [{transform_indices = @transform_0, window_bounds = array<i64: 1, 8, 16>}, {pipeline_mode = #tpu.pipeline_mode<synchronous>, transform_indices = @transform_1, window_bounds = array<i64: 16, 128>}, {transform_indices = @transform_2, window_bounds = array<i64: 1, 8, 128>}]} {
    %c0 = arith.constant 0 : index
    %c0_0 = arith.constant 0 : index
    %c0_1 = arith.constant 0 : index
    %0 = vector.load %arg2[%c0, %c0_0, %c0_1] : memref<1x8x16xbf16, #tpu.memory_space<vmem>>, vector<1x8x16xbf16>
    %1 = vector.shape_cast %0 : vector<1x8x16xbf16> to vector<8x16xbf16>
    %c0_2 = arith.constant 0 : index
    %c0_3 = arith.constant 0 : index
    %2 = vector.load %arg3[%c0_2, %c0_3] : memref<16x128xbf16, #tpu.memory_space<vmem>>, vector<16x128xbf16>
    %cst = arith.constant dense<0.000000e+00> : vector<8x128xf32>
    %3 = tpu.matmul %1, %2, %cst {dimension_numbers = #tpu.dot_dimension_numbers<[1], [0], [0], [1], [0, 0, 1, 1], [], []>} : vector<8x16xbf16>, vector<16x128xbf16>, vector<8x128xf32> -> vector<8x128xf32>
    %4 = arith.truncf %3 : vector<8x128xf32> to vector<8x128xbf16>
    %c0_4 = arith.constant 0 : index
    %c0_5 = arith.constant 0 : index
    %c0_6 = arith.constant 0 : index
    %5 = vector.load %arg4[%c0_4, %c0_5, %c0_6] : memref<1x8x128xbf16, #tpu.memory_space<vmem>>, vector<1x8x128xbf16>
    %6 = vector.shape_cast %5 : vector<1x8x128xbf16> to vector<8x128xbf16>
    %7 = vector.shape_cast %4 : vector<8x128xbf16> to vector<1x8x128xbf16>
    tpu.vector_store %arg4[%c0_4, %c0_5, %c0_6], %7 {strides = array<i32>} : memref<1x8x128xbf16, #tpu.memory_space<vmem>>, vector<1x8x128xbf16>,
    return
  }
  func.func @transform_0(%arg0: i32, %arg1: i32) -> (i32, i32, i32) {
    %c0_i32 = arith.constant 0 : i32
    %c0_i32_0 = arith.constant 0 : i32
    return %arg0, %arg1, %c0_i32 : i32, i32, i32
  }
  func.func @transform_1(%arg0: i32, %arg1: i32) -> (i32, i32) {
    %c0_i32 = arith.constant 0 : i32
    %c0_i32_0 = arith.constant 0 : i32
    %c0_i32_1 = arith.constant 0 : i32
    return %c0_i32, %c0_i32_0 : i32, i32
  }
  func.func @transform_2(%arg0: i32, %arg1: i32) -> (i32, i32, i32) {
    %c0_i32 = arith.constant 0 : i32
    %c0_i32_0 = arith.constant 0 : i32
    return %arg0, %arg1, %c0_i32 : i32, i32, i32
  }
}

</mosaic_0001>

<bundles_post_ra>
// kernel: tpu_custom_call.1
= control target key start
LH: loop header
LB: loop body
LE: loop exit
PB: predicated region body
PF: predicated region fallthrough
CT: control target
= control target key end

     0   :  { %7 = vsyncpa [#allocation3], 0  ;;  %s796_s0 = inlined_call_operand.hbm [shape: bf16[2,8,16], index: 0, kind: input, shape index: {}]   ;;  %s797_s1 = inlined_call_operand.hbm [shape: bf16[16,128], index: 1, kind: input, shape index: {}]   ;;  %s798_s2 = inlined_call_operand.hbm [shape: bf16[2,8,128], index: 2, kind: output, shape index: {}]  }
   0x1   :  { %9 = vsyncpa [#allocation3 + $0x1], 0 }
   0x2   :  { %10 = vsyncpa [#allocation6], 0 }
   0x3   :  { %11 = vsyncpa [#allocation4], 0 }
   0x4   :  { %13 = vsyncpa [#allocation4 + $0x1], 0  ;;  %s617_s9 = smov 0   ;;  %s619_s10 = smov 0  }
   0x5   :  { %s621_s11 = smov 0   ;;  %s623_s12 = smov 0  }
   0x6   :  { %s625_s13 = smov 0   ;;  %s627_s14 = smov 0  }
   0x7 LB: > { %s352_s15 = sadd.s32 4294967295, %s593_s14   ;;  %s353_s16 = sadd.s32 4294967294, %s593_s14   ;;  %s593_s14 = sphi %s627_s14, %s19_s14   ;;  %s589_s13 = sphi %s625_s13, %s816_s13   ;;  %s585_s12 = sphi %s623_s12, %s815_s12   ;;  %s581_s11 = sphi %s621_s11, %s814_s11   ;;  %s577_s10 = sphi %s619_s10, %s813_s10   ;;  %s573_s9 = sphi %s617_s9, %s812_s9  }
   0x8   : > { %p53_p0 = scmp.ne.s32.totalorder %s577_s10, %s573_s9  ;;  %p651_p1 = scmp.eq.s32.totalorder %s352_s15, 0 }
   0x9   : > { %p655_p2 = scmp.eq.s32.totalorder %s352_s15, 1  ;;  %p106_p3 = scmp.eq.s32.totalorder %s353_s16, 1 }
   0xa   : > { %p661_p4 = por %p651_p1, %p53_p0  ;;  %p354_p5 = scmp.ge.s32.totalorder %s593_s14, 1 }
   0xb   : > { %p666_p6 = por %p106_p3, %p53_p0  ;;  %p113_p7 = scmp.lt.s32.totalorder %s593_s14, 3 }
   0xc   : > { %s802_s19 = scalar_select %p661_p4, 1, 0 }
   0xd   : > { %s803_s20 = scalar_select %p666_p6, 1, 0 }
   0xe   : > { %p671_p8 = pnand %p354_p5, %p113_p7  ;;  %s595_s22 = smov [#allocation5]  }
   0xf   : > { %s125_s23 = sshll.u32 %s595_s22, 4  ;;  %s31_s25 = sadd.s32 1, %s589_s13  ;;  %s126_s23 = int_to_ptr.vmem [resolvable:$true] %s125_s23 }
  0x10   : > { %p385_p9 = pneg %p671_p8  ;;  %s466_s26 = scalar_lea.vmem %s126_s23, 128 }
  0x11   : > { %p467_p13 = scmp.ne.s32.totalorder %s126_s23, %s466_s26  ;;  %p474_p5 = scmp.lt.s32.totalorder %s126_s23, %s126_s23 }
  0x12   : > { %p680_p11 = pnand %p385_p9, %p651_p1  ;;  %p475_p7 = scmp.lt.s32.totalorder %s466_s26, %s466_s26 }
  0x14   : > { %p457_p12 = pneg %p680_p11  ;;  %p476_p6 = por %p475_p7, %p474_p5 }
  0x16   : > { %p469_p0 = pnand %p467_p13, %p457_p12 }
  0x18   : > { %p470_p3 = pneg %p469_p0 }
  0x1a   : > { %p477_p4 = pnand %p476_p6, %p470_p3 }
  0x1c   : > { %480 = shalt.err (!%p477_p4)
}
  0x1d   : > { %s596_s27 = smov 64   ;;  %s597_s28 = smov 4  }
  0x1e   : > { %388 = dma.hbm_to_vmem [thread:$0]  (!%p680_p11), %s797_s1, 128, %s126_s23, [#allocation6], %s596_s27, %s596_s27, %s597_s28  }
  0x1f   : > { %p33_p6 = scmp.ge.s32.totalorder %s31_s25, 2  ;;  %s40_s3 = sadd.s32 1, %s581_s11 }
  0x20   : > { %p47_p4 = scmp.ne.s32.totalorder %s581_s11, %s577_s10  ;;  %p48_p9 = scmp.eq.s32.totalorder %s593_s14, 0 }
  0x21   : > { %s818_s25 = smov (%p33_p6, %s31_s25), 0  ;;  %p398_p0 = scmp.lt.s32.totalorder %s593_s14, 2 }
  0x22   : > { %p698_p12 = por %p48_p9, %p47_p4  ;;  %p704_p13 = por %p655_p2, %p47_p4 }
  0x23   : > { %s35_s6 = ssub.s32 %s589_s13, %s818_s25  ;;  %s139_s7 = sand.u32 1, %s581_s11  }
  0x24   : > { %p38_p11 = scmp.eq.s32.totalorder %s35_s6, 0  ;;  %s357_s8 = sshll.u32 %s139_s7, 2 }
  0x25   : > { %s358_s16 = sshll.u32 %s589_s13, 6  ;;  %s143_s26 = scalar_lea.vmem [#allocation2], %s357_s8 }
  0x26   : > { %s713_s15 = scalar_select %p38_p11, %s581_s11, %s40_s3  }
  0x27   : > { %s149_s24 = scalar_lea.hbm %s796_s0, %s358_s16  ;;  %s151_s27 = sshll.u32 %s143_s26, 4  ;;  %s152_s27 = int_to_ptr.vmem [resolvable:$true] %s151_s27 }
  0x28   : > { %p721_p2 = pnand %p398_p0, %p698_p12  ;;  %s140_s28 = scalar_lea.sflag [#allocation3], %s139_s7 }
  0x29   : > { %s494_s29 = scalar_lea.vmem %s152_s27, 64  ;;  %s598_s30 = smov [#allocation2]  }
  0x2a   : > { %p483_p3 = pneg %p721_p2  ;;  %p495_p5 = scmp.ne.s32.totalorder %s152_s27, %s494_s29 }
  0x2b   : > { %s499_s3 = sshll.u32 %s598_s30, 4  ;;  %s500_s3 = int_to_ptr.vmem [resolvable:$false] %s499_s3 }
  0x2c   : > { %p497_p7 = pnand %p495_p5, %p483_p3  ;;  %s501_s6 = scalar_lea.vmem %s500_s3, 128 }
  0x2d   : > { %p502_p4 = scmp.lt.s32.totalorder %s152_s27, %s500_s3  ;;  %p503_p9 = scmp.lt.s32.totalorder %s501_s6, %s494_s29 }
  0x2e   : > { %p498_p6 = pneg %p497_p7 }
  0x2f   : > { %p504_p11 = por %p503_p9, %p502_p4 }
  0x31   : > { %p505_p10 = pnand %p504_p11, %p498_p6 }
  0x33   : > { %508 = shalt.err (!%p505_p10)
}
  0x34   : > { %392 = dma.hbm_to_vmem [thread:$0]  (!%p721_p2), %s149_s24, 64, %s152_s27, %s140_s28  }
  0x35   : > { %160 = sbr.rel (%p671_p8) target bundleno = 275 (0x113), region = 28  ;;  %s732_s4 = sand.u32 (!%p671_p8), 1, %s577_s10  }
  0x36   : > { %s360_s7 = sshll.u32 (!%p671_p8), %s732_s4, 2  ;;  %s163_s8 = scalar_lea.sflag (!%p671_p8), [#allocation3], %s732_s4 }
  0x37   : > { %s166_s16 = scalar_lea.vmem (!%p671_p8), [#allocation2], %s360_s7  ;;  %p809_p12 = scmp.ne.s32.totalorder (!%p671_p8), %s802_s19, 0 }
  0x3a   : > { %560 = dma.done.wait (%p809_p12), %s163_s8, 64  }
  0x3b   : > { %562 = vsyncadd (%p809_p12), %s163_s8, 4294967232 }
  0x3c   : > { %564 = dma.done.wait (%p651_p1), [#allocation6], 128  }
  0x3d   : > { %566 = vsyncadd (%p651_p1), [#allocation6], 4294967168  ;;  %v599_v0 = vmov 0.0   ;;  %vm600_vm0 = vmmov 0   ;;  %v454_v1 = vld [vmem:[#allocation5] sm:$0xff]   ;;  %vm201_vm1 = vcmask 130048  }
  0x3e   : > { %371 = vmatprep.subr.bf16.mxu0 %v599_v0  ;;  %373 = vmatprep.mubr.msk.bf16.mxu0 %vm600_vm0, %v599_v0  ;;  %v192_v2 = vld [vmem:[%s166_s16] sm:$0xf]  ;;  %s366_s19 = sshll.u32 %s585_s12, 6  ;;  %s190_s21 = scalar_lea.vmem [#allocation7], %s360_s7 }
  0x3f   : > { %372 = vmatpush3.bf16.msra.mxu0 %v454_v1  ;;  %s262_s22 = sshll.u32 %s190_s21, 4  ;;  %s748_s24 = scalar_lea.hbm %s798_s2, %s366_s19  ;;  %s750_s22 = int_to_ptr.vmem [resolvable:$true] %s262_s22 }
  0x40   : > { %s248_s26 = scalar_lea.sflag [#allocation4], %s732_s4  ;;  %s509_s27 = scalar_lea.vmem %s750_s22, 64 }
  0x41   : > { %p510_p1 = scmp.ne.s32.totalorder %s750_s22, %s509_s27  ;;  %s601_s12 = smov [#allocation7]  }
  0x42   : > { %374 = vmatmul.mubr.msk.bf16.vlgmr.msra.gmra.mxu0 %vm201_vm1, %v192_v2  ;;  %s513_s18 = sshll.u32 %s601_s12, 4  ;;  %s514_s18 = int_to_ptr.vmem [resolvable:$false] %s513_s18 }
  0x43   : > { %p511_p8 = pnand %p510_p1, %p704_p13  ;;  %s515_s28 = scalar_lea.vmem %s514_s18, 128 }
  0x44   : > { %p516_p0 = scmp.lt.s32.totalorder %s750_s22, %s514_s18  ;;  %p517_p2 = scmp.lt.s32.totalorder %s515_s28, %s509_s27 }
  0x45   : > { %p512_p10 = pneg %p511_p8 }
  0x46   : > { %p518_p3 = por %p517_p2, %p516_p0 }
  0x48   : > { %p519_p5 = pnand %p518_p3, %p512_p10 }
 0x102   : > { %v239_v3 = vpop.f32.mrf.mxu0 }
 0x103   : > { %v245_v4 = vpack.c.bf16 %v239_v3, %v239_v3 }
 0x104   : > { %v375_v5 = vpop.f32.mrf.mxu0 }
 0x105   : > { %246 = vst [vmem:[%s190_s21] sm:$0xf] %v245_v4 }
 0x106   : > { %v242_v6 = vpop.f32.mrf.mxu0 }
 0x107   : > { %522 = shalt.err (!%p519_p5)
}
 0x108   : > { %s523_s29 = scalar_lea.hbm %s748_s24, 64  ;;  %s527_s6 = scalar_lea.hbm %s798_s2, 128 }
 0x109   : > { %p524_p7 = scmp.ne.s32.totalorder %s748_s24, %s523_s29  ;;  %p528_p9 = scmp.lt.s32.totalorder %s748_s24, %s798_s2 }
 0x10a   : > { %p529_p11 = scmp.lt.s32.totalorder %s527_s6, %s523_s29 }
 0x10b   : > { %p525_p6 = pnand %p524_p7, %p704_p13 }
 0x10c   : > { %p530_p12 = por %p529_p11, %p528_p9 }
 0x10d   : > { %p526_p4 = pneg %p525_p6 }
 0x10f   : > { %p531_p1 = pnand %p530_p12, %p526_p4 }
 0x111   : > { %534 = shalt.err (!%p531_p1)
}
 0x112   : > { %383 = dma.vmem_to_hbm [thread:$0]  (%p704_p13), %s750_s22, 64, %s748_s24, %s248_s26   ;;  %v376_v7 = vpop.f32.mrf.mxu0 }
 0x113 PF: > { %s274_s8 = sand.u32 1, %s573_s9   ;;  %p810_p8 = scmp.ne.s32.totalorder %s803_s20, 0 }
 0x114   : > { %p811_p10 = scmp.ge.s32.totalorder %s593_s14, 2  ;;  %s275_s16 = scalar_lea.sflag [#allocation4], %s274_s8 }
 0x116   : > { %p394_p0 = pnand %p811_p10, %p810_p8 }
 0x118   : > { %p395_p2 = pneg %p394_p0 }
 0x11a   : > { %568 = dma.done.wait (%p395_p2), %s275_s16, 64  }
 0x11b   : > { %570 = vsyncadd (%p395_p2), %s275_s16, 4294967232  ;;  %s19_s14 = sadd.s32 1, %s593_s14   ;;  %s812_s9 = smov %s577_s10 }
 0x11c   : > { %p16_p3 = scmp.ge.s32.totalorder %s19_s14, 4   ;;  %s813_s10 = smov %s581_s11 }
 0x11d   : > { %s814_s11 = smov %s713_s15  ;;  %s815_s12 = smov %s589_s13 }
 0x11e   : > { %s816_s13 = smov %s818_s25  ;;  %18 = sbr.rel (!%p16_p3) target bundleno = 7 (0x7), region = 77 }
 0x123   :  { %280 = vsyncpa [#allocation3], 1 }
 0x124   :  { %282 = vsyncpa [#allocation3 + $0x1], 1 }
 0x125   :  { %283 = vsyncpa [#allocation6], 1 }
 0x126   :  { %284 = vsyncpa [#allocation4], 1 }
 0x127   :  { %286 = vsyncpa [#allocation4 + $0x1], 1 }

</bundles_post_ra>
